<compile_context>
chip_gen: v7x
topology: tpu7x:2x2x1
jax: 0.10.0
libtpu: 0.0.40
codegen_flags: <defaults>
</compile_context>

<pallas_src>
import functools

import jax
import jax.numpy as jnp
from jax import lax
from jax.experimental import pallas as pl
from jax.experimental.pallas import tpu as pltpu

FEATURES = 4       # `features` of the PyTorch module (kept small)
IN_CHANNELS = 3
SPATIAL = 256      # network has 8 stride-2 stages -> needs >= 256
MAX_TM = 8192      # lane-axis rows per grid step for the big layers


# ----------------------------------------------------------------------------
# Fused transposed-GEMM kernel:  o = act( sum_i w_i @ x_i + bias )
#   w_i : (cout, K_i) bf16   (BN scale already folded in)
#   x_i : (K_i, tm)  bf16    (patch matrix, spatial M on the lane axis)
#   bias: (cout, 1)  f32
#   o   : (cout, tm)         lane-dense writeback (tm multiple of 128 or full M)
# ----------------------------------------------------------------------------
def _gemm_bias_act_kernel(*refs, n_in, act):
    b_ref = refs[2 * n_in]
    o_ref = refs[2 * n_in + 1]
    acc = jnp.dot(refs[0][...], refs[1][...], preferred_element_type=jnp.float32)
    for i in range(1, n_in):
        acc = acc + jnp.dot(refs[2 * i][...], refs[2 * i + 1][...],
                            preferred_element_type=jnp.float32)
    y = acc + b_ref[...]
    if act == "leaky":
        y = jnp.where(y > 0, y, 0.2 * y)
    elif act == "relu":
        y = jnp.maximum(y, 0.0)
    elif act == "tanh":
        y = jnp.tanh(y)
    o_ref[...] = y.astype(o_ref.dtype)


def _num_m_blocks(G, M):
    # Want >= 2 parallel grid units so both v7x TensorCores get work, but only
    # ~2 steps so the ~0.35us per-grid-step overhead never dominates.  The
    # convT calls already carry G=4 parity groups, so one full-M block there.
    if G >= 2 or M < 256 or M % 256 != 0:
        return 1
    blocks = max(2, -(-M // MAX_TM))
    while (M // 128) % blocks:          # keep tm a multiple of 128 (lane-dense)
        blocks += 1
    return blocks


def grouped_gemm_bias_act(pairs, bias, act, out_dtype):
    """act( sum_i w_i[g] @ x_i[g] + bias ) for every group g.

    pairs: list of (w3 (G, cout, K_i) bf16, x3 (G, K_i, M) bf16).
    bias : (cout,) f32.   Returns (G, cout, M) in out_dtype.
    cout and K are full-extent blocks (never padded); only M — the lane axis of
    both the x blocks and the output block — is tiled.
    """
    G, cout, _ = pairs[0][0].shape
    M = pairs[0][1].shape[2]
    blocks = _num_m_blocks(G, M)
    tm = M // blocks

    in_specs, args = [], []
    for w3, x3 in pairs:
        K = w3.shape[2]
        in_specs.append(pl.BlockSpec((None, cout, K), lambda g, m: (g, 0, 0)))
        in_specs.append(pl.BlockSpec((None, K, tm), lambda g, m: (g, 0, m)))
        args += [w3, x3]
    in_specs.append(pl.BlockSpec((cout, 1), lambda g, m: (0, 0)))
    args.append(bias.reshape(cout, 1).astype(jnp.float32))

    return pl.pallas_call(
        functools.partial(_gemm_bias_act_kernel, n_in=len(pairs), act=act),
        out_shape=jax.ShapeDtypeStruct((G, cout, M), out_dtype),
        grid_spec=pltpu.PrefetchScalarGridSpec(
            num_scalar_prefetch=0,
            grid=(G, blocks),
            in_specs=in_specs,
            out_specs=pl.BlockSpec((None, cout, tm), lambda g, m: (g, 0, m)),
        ),
        compiler_params=pltpu.CompilerParams(
            dimension_semantics=("parallel", "parallel")),
    )(*args)


# ----------------------------------------------------------------------------
# Conv2d(k=4, s=2, p=1) via transposed im2col + fused Pallas GEMM
# ----------------------------------------------------------------------------
def conv4x4_s2(x, w, scale, bias, act, pad_mode, out_dtype=jnp.bfloat16):
    # x: (Cin, N, H, W) channel-first;  w: (Cout, Cin, 4, 4) (PyTorch Conv2d)
    cin, n, h, wd = x.shape
    cout = w.shape[0]
    ho, wo = h // 2, wd // 2
    xp = jnp.pad(x.astype(jnp.bfloat16), ((0, 0), (0, 0), (1, 1), (1, 1)),
                 mode=pad_mode)
    taps = []
    for ky in range(4):
        for kx in range(4):
            taps.append(xp[:, :, ky:ky + 2 * ho:2, kx:kx + 2 * wo:2])
    xt = jnp.stack(taps, axis=1).reshape(16 * cin, n * ho * wo)   # (K, M)
    # fold BN scale (per output channel) into the weight matrix
    wm = (w.reshape(cout, 16 * cin) * scale[:, None]).astype(jnp.bfloat16)
    y = grouped_gemm_bias_act([(wm[None], xt[None])], bias, act, out_dtype)
    return y[0].reshape(cout, n, ho, wo)


# ----------------------------------------------------------------------------
# ConvTranspose2d(k=4, s=2, p=1) via 4 parity 2x2 convs (ONE pallas_call)
# + sub-pixel interleave.  The skip concat is fused as a second K-partial input.
# ----------------------------------------------------------------------------
def convT4x4_s2(parts, scale, bias, act, out_dtype=jnp.bfloat16):
    # parts: list of (x (Cin_p, N, H, W), w (Cin_p, Cout, 4, 4)) channel slices
    _, n, h, wd = parts[0][0].shape
    cout = parts[0][1].shape[1]
    pairs = []
    for x, w in parts:
        cin = x.shape[0]
        xp = jnp.pad(x.astype(jnp.bfloat16), ((0, 0), (0, 0), (1, 1), (1, 1)))
        xs, ws = [], []
        for a in range(2):
            for b in range(2):
                taps = []
                for r in range(2):
                    for s in range(2):
                        taps.append(xp[:, :, a + r:a + r + h, b + s:b + s + wd])
                xs.append(jnp.stack(taps, axis=1).reshape(4 * cin, n * h * wd))
                # kernel taps hit by output parity (a, b): ky=3-a-2r, kx=3-b-2s
                wk = jnp.stack(
                    [jnp.stack([w[:, :, 3 - a - 2 * r, 3 - b - 2 * s]
                                for s in range(2)], axis=-1)
                     for r in range(2)], axis=-2)            # (cin, cout, 2, 2)
                wk = jnp.transpose(wk, (1, 0, 2, 3)).reshape(cout, 4 * cin)
                ws.append(wk * scale[:, None])
        pairs.append((jnp.stack(ws, 0).astype(jnp.bfloat16),   # (4, cout, 4cin)
                      jnp.stack(xs, 0)))                       # (4, 4cin, M)
    y = grouped_gemm_bias_act(pairs, bias, act, out_dtype)     # (4, cout, M)
    # sub-pixel interleave: parity (a, b) at (i, j) -> output (2i+a, 2j+b)
    y = y.reshape(2, 2, cout, n, h, wd)
    return jnp.transpose(y, (2, 3, 4, 0, 5, 1)).reshape(cout, n, 2 * h, 2 * wd)


# ----------------------------------------------------------------------------
# Parameters (deterministic synthetic init, PyTorch weight layouts)
# ----------------------------------------------------------------------------
def init_params(key, f=FEATURES, in_ch=IN_CHANNELS):
    keys = iter(jax.random.split(key, 64))
    p = {}

    def conv_w(cout, cin):
        return jax.random.normal(next(keys), (cout, cin, 4, 4), jnp.float32) * 0.05

    def convT_w(cin, cout):
        return jax.random.normal(next(keys), (cin, cout, 4, 4), jnp.float32) * 0.05

    def bn(c):
        gamma = 1.0 + 0.02 * jax.random.normal(next(keys), (c,), jnp.float32)
        beta = 0.02 * jax.random.normal(next(keys), (c,), jnp.float32)
        # eval-mode fold: running_mean=0, running_var=1, eps=1e-5
        return gamma / jnp.sqrt(1.0 + 1e-5), beta

    p["init_w"] = conv_w(f, in_ch)
    p["init_b"] = 0.02 * jax.random.normal(next(keys), (f,), jnp.float32)

    down_dims = [(f, 2 * f), (2 * f, 4 * f), (4 * f, 8 * f),
                 (8 * f, 8 * f), (8 * f, 8 * f), (8 * f, 8 * f)]
    p["down"] = []
    for cin, cout in down_dims:
        s, b = bn(cout)
        p["down"].append({"w": conv_w(cout, cin), "s": s, "b": b})

    p["bot_w"] = conv_w(8 * f, 8 * f)
    p["bot_b"] = 0.02 * jax.random.normal(next(keys), (8 * f,), jnp.float32)

    up_dims = [(8 * f, 8 * f), (16 * f, 8 * f), (16 * f, 8 * f), (16 * f, 8 * f),
               (16 * f, 4 * f), (8 * f, 2 * f), (4 * f, f)]
    p["up"] = []
    for cin, cout in up_dims:
        s, b = bn(cout)
        p["up"].append({"w": convT_w(cin, cout), "s": s, "b": b})

    p["fin_w"] = convT_w(2 * f, in_ch)
    p["fin_b"] = 0.02 * jax.random.normal(next(keys), (in_ch,), jnp.float32)
    return p


# ----------------------------------------------------------------------------
# Generator forward (mirrors the PyTorch module exactly, eval mode)
# ----------------------------------------------------------------------------
def generator_forward(x_nchw, p):
    x = jnp.transpose(x_nchw, (1, 0, 2, 3))             # NCHW -> CNHW
    f = FEATURES
    ones = lambda c: jnp.ones((c,), jnp.float32)

    # initial: reflect-pad conv + bias, LeakyReLU(0.2)
    d1 = conv4x4_s2(x, p["init_w"], ones(f), p["init_b"], "leaky", "reflect")
    downs = [d1]
    cur = d1
    # down1..down6: reflect-pad conv (no bias) + BN + LeakyReLU(0.2)
    for blk in p["down"]:
        cur = conv4x4_s2(cur, blk["w"], blk["s"], blk["b"], "leaky", "reflect")
        downs.append(cur)                                # downs = [d1..d7]

    # bottleneck: zero-pad conv + bias + ReLU
    bottleneck = conv4x4_s2(downs[-1], p["bot_w"], ones(8 * f), p["bot_b"],
                            "relu", "constant")

    # up1..up7: convT (no bias) + BN + ReLU (+ dropout -> identity in eval).
    # Skip concats are fused as a second K-partial input to the GEMM.
    up = convT4x4_s2([(bottleneck, p["up"][0]["w"])],
                     p["up"][0]["s"], p["up"][0]["b"], "relu")
    for i in range(1, 7):
        skip = downs[7 - i]                              # d7, d6, ..., d2
        w = p["up"][i]["w"]
        c_up = up.shape[0]
        up = convT4x4_s2([(up, w[:c_up]), (skip, w[c_up:])],
                         p["up"][i]["s"], p["up"][i]["b"], "relu")

    # final: convT + bias + Tanh, skip with d1 (output kept in f32)
    wf = p["fin_w"]
    c_up = up.shape[0]
    out = convT4x4_s2([(up, wf[:c_up]), (downs[0], wf[c_up:])],
                      ones(IN_CHANNELS), p["fin_b"], "tanh",
                      out_dtype=jnp.float32)
    return jnp.transpose(out, (1, 0, 2, 3))              # CNHW -> NCHW


# ----------------------------------------------------------------------------
# Pure-XLA reference convolutions (for numerical validation of the kernels)
# ----------------------------------------------------------------------------
def _act(y, act):
    if act == "leaky":
        return jnp.where(y > 0, y, 0.2 * y)
    if act == "relu":
        return jnp.maximum(y, 0.0)
    if act == "tanh":
        return jnp.tanh(y)
    return y


def _conv_ref(x, w, bias, act, pad_mode):
    xb = x.astype(jnp.bfloat16).astype(jnp.float32)
    wb = w.astype(jnp.bfloat16).astype(jnp.float32)
    xn = jnp.pad(jnp.transpose(xb, (1, 0, 2, 3)),
                 ((0, 0), (0, 0), (1, 1), (1, 1)), mode=pad_mode)
    y = lax.conv_general_dilated(xn, wb, (2, 2), "VALID",
                                 dimension_numbers=("NCHW", "OIHW", "NCHW"),
                                 precision=lax.Precision.HIGHEST)
    return jnp.transpose(_act(y + bias[None, :, None, None], act), (1, 0, 2, 3))


def _convT_ref(x, w, bias, act):
    xb = x.astype(jnp.bfloat16).astype(jnp.float32)
    wb = w.astype(jnp.bfloat16).astype(jnp.float32)
    wr = jnp.transpose(wb, (1, 0, 2, 3))[:, :, ::-1, ::-1]
    y = lax.conv_general_dilated(jnp.transpose(xb, (1, 0, 2, 3)), wr, (1, 1),
                                 [(2, 2), (2, 2)], lhs_dilation=(2, 2),
                                 dimension_numbers=("NCHW", "OIHW", "NCHW"),
                                 precision=lax.Precision.HIGHEST)
    return jnp.transpose(_act(y + bias[None, :, None, None], act), (1, 0, 2, 3))


if __name__ == "__main__":
    # --- building-block numerical checks vs XLA reference convolutions ---
    kc = jax.random.split(jax.random.PRNGKey(1), 6)
    xc = jax.random.normal(kc[0], (6, 2, 16, 16), jnp.float32)
    wc = jax.random.normal(kc[1], (5, 6, 4, 4), jnp.float32) * 0.1
    bc = jax.random.normal(kc[2], (5,), jnp.float32) * 0.1
    got = conv4x4_s2(xc, wc, jnp.ones((5,), jnp.float32), bc, "leaky",
                     "reflect", out_dtype=jnp.float32)
    ref = _conv_ref(xc, wc, bc, "leaky", "reflect")
    assert float(jnp.max(jnp.abs(got - ref))) < 2e-2, "conv mismatch"

    xt = jax.random.normal(kc[3], (6, 2, 16, 16), jnp.float32)
    wt = jax.random.normal(kc[4], (6, 5, 4, 4), jnp.float32) * 0.1
    bt = jax.random.normal(kc[5], (5,), jnp.float32) * 0.1
    gotT = convT4x4_s2([(xt[:4], wt[:4]), (xt[4:], wt[4:])],   # fused K-split
                       jnp.ones((5,), jnp.float32), bt, "relu",
                       out_dtype=jnp.float32)
    refT = _convT_ref(xt, wt, bt, "relu")
    assert float(jnp.max(jnp.abs(gotT - refT))) < 2e-2, "convT mismatch"

    # --- full Generator forward ---
    key = jax.random.PRNGKey(0)
    pkey, xkey = jax.random.split(key)
    params = init_params(pkey)
    x = jax.random.normal(xkey, (1, IN_CHANNELS, SPATIAL, SPATIAL), jnp.float32)

    fwd = jax.jit(generator_forward)
    y = jax.block_until_ready(fwd(x, params))

    assert y.shape == (1, IN_CHANNELS, SPATIAL, SPATIAL), y.shape
    assert y.dtype == jnp.float32
    assert bool(jnp.all(jnp.isfinite(y)))
    assert bool(jnp.all(jnp.abs(y) <= 1.0))              # tanh output range
    print("KERNEL_OK")
</pallas_src>

<mosaic_0001>
module attributes {stable_mosaic.version = 11 : i64} {
  func.func @_gemm_bias_act_kernel(%arg0: i32, %arg1: i32, %arg2: memref<1x5x96xbf16, #tpu.memory_space<vmem>>, %arg3: memref<1x96x128xbf16, #tpu.memory_space<vmem>>, %arg4: memref<5x1xf32, #tpu.memory_space<vmem>>, %arg5: memref<1x5x128xf32, #tpu.memory_space<vmem>>) attributes {dimension_semantics = [#tpu.dimension_semantics<parallel>, #tpu.dimension_semantics<parallel>], iteration_bounds = array<i64: 1, 1>, scalar_prefetch = 0 : i64, scratch_operands = 0 : i64, tpu.core_type = #tpu.core_type<tc>, window_params = [{transform_indices = @transform_0, window_bounds = array<i64: 1, 5, 96>}, {transform_indices = @transform_1, window_bounds = array<i64: 1, 96, 128>}, {pipeline_mode = #tpu.pipeline_mode<synchronous>, transform_indices = @transform_2, window_bounds = array<i64: 5, 1>}, {transform_indices = @transform_3, window_bounds = array<i64: 1, 5, 128>}]} {
    %c0 = arith.constant 0 : index
    %c0_0 = arith.constant 0 : index
    %c0_1 = arith.constant 0 : index
    %0 = vector.load %arg2[%c0, %c0_0, %c0_1] : memref<1x5x96xbf16, #tpu.memory_space<vmem>>, vector<1x5x96xbf16>
    %1 = vector.shape_cast %0 : vector<1x5x96xbf16> to vector<5x96xbf16>
    %c0_2 = arith.constant 0 : index
    %c0_3 = arith.constant 0 : index
    %c0_4 = arith.constant 0 : index
    %2 = vector.load %arg3[%c0_2, %c0_3, %c0_4] : memref<1x96x128xbf16, #tpu.memory_space<vmem>>, vector<1x96x128xbf16>
    %3 = vector.shape_cast %2 : vector<1x96x128xbf16> to vector<96x128xbf16>
    %cst = arith.constant dense<0.000000e+00> : vector<5x128xf32>
    %4 = tpu.matmul %1, %3, %cst {dimension_numbers = #tpu.dot_dimension_numbers<[1], [0], [0], [1], [0, 0, 1, 1], [], []>} : vector<5x96xbf16>, vector<96x128xbf16>, vector<5x128xf32> -> vector<5x128xf32>
    %c0_5 = arith.constant 0 : index
    %c0_6 = arith.constant 0 : index
    %5 = vector.load %arg4[%c0_5, %c0_6] : memref<5x1xf32, #tpu.memory_space<vmem>>, vector<5x1xf32>
    %6 = vector.broadcast %5 : vector<5x1xf32> to vector<5x128xf32>
    %7 = arith.addf %4, %6 : vector<5x128xf32>
    %cst_7 = arith.constant 0.000000e+00 : f32
    %8 = vector.broadcast %cst_7 : f32 to vector<5x128xf32>
    %9 = arith.cmpf ogt, %7, %8 : vector<5x128xf32>
    %cst_8 = arith.constant 2.000000e-01 : f32
    %10 = vector.broadcast %cst_8 : f32 to vector<5x128xf32>
    %11 = arith.mulf %10, %7 : vector<5x128xf32>
    %12 = arith.select %9, %7, %11 : vector<5x128xi1>, vector<5x128xf32>
    %c0_9 = arith.constant 0 : index
    %c0_10 = arith.constant 0 : index
    %c0_11 = arith.constant 0 : index
    %13 = vector.load %arg5[%c0_9, %c0_10, %c0_11] : memref<1x5x128xf32, #tpu.memory_space<vmem>>, vector<1x5x128xf32>
    %14 = vector.shape_cast %13 : vector<1x5x128xf32> to vector<5x128xf32>
    %15 = vector.shape_cast %12 : vector<5x128xf32> to vector<1x5x128xf32>
    tpu.vector_store %arg5[%c0_9, %c0_10, %c0_11], %15 {strides = array<i32>} : memref<1x5x128xf32, #tpu.memory_space<vmem>>, vector<1x5x128xf32>,
    return
  }
  func.func @transform_0(%arg0: i32, %arg1: i32) -> (i32, i32, i32) {
    %c0_i32 = arith.constant 0 : i32
    %c0_i32_0 = arith.constant 0 : i32
    %c0_i32_1 = arith.constant 0 : i32
    return %arg0, %c0_i32, %c0_i32_0 : i32, i32, i32
  }
  func.func @transform_1(%arg0: i32, %arg1: i32) -> (i32, i32, i32) {
    %c0_i32 = arith.constant 0 : i32
    %c0_i32_0 = arith.constant 0 : i32
    return %arg0, %c0_i32, %arg1 : i32, i32, i32
  }
  func.func @transform_2(%arg0: i32, %arg1: i32) -> (i32, i32) {
    %c0_i32 = arith.constant 0 : i32
    %c0_i32_0 = arith.constant 0 : i32
    %c0_i32_1 = arith.constant 0 : i32
    return %c0_i32, %c0_i32_0 : i32, i32
  }
  func.func @transform_3(%arg0: i32, %arg1: i32) -> (i32, i32, i32) {
    %c0_i32 = arith.constant 0 : i32
    %c0_i32_0 = arith.constant 0 : i32
    return %arg0, %c0_i32, %arg1 : i32, i32, i32
  }
}

</mosaic_0001>

<bundles_post_ra>
// kernel: tpu_custom_call.1
= control target key start
LH: loop header
LB: loop body
LE: loop exit
PB: predicated region body
PF: predicated region fallthrough
CT: control target
= control target key end

     0   :  { %8 = vsyncpa [#allocation3], 0  ;;  %s204_s12 = smov [#allocation2]   ;;  %s251_s0 = inlined_call_operand.vmem [shape: bf16[1,5,96], index: 0, kind: input, shape index: {}]   ;;  %s252_s1 = inlined_call_operand.hbm [shape: bf16[1,96,128], index: 1, kind: input, shape index: {}]   ;;  %s253_s2 = inlined_call_operand.vmem [shape: f32[5,1], index: 2, kind: input, shape index: {}]   ;;  %s254_s3 = inlined_call_operand.vmem [shape: f32[1,5,128], index: 3, kind: output, shape index: {}]  }
   0x1   :  { %s16_s13 = sshll.u32 %s204_s12, 4  ;;  %s180_s16 = scalar_lea.hbm %s252_s1, 768  ;;  %s17_s13 = int_to_ptr.vmem [resolvable:$true] %s16_s13 }
   0x2   :  { %p181_p0 = scmp.ne.s32.totalorder %s252_s1, %s180_s16  ;;  %p184_p1 = scmp.lt.u32.totalorder %s180_s16, %s252_s1 }
   0x4   :  { %p186_p2 = pnand %p184_p1, %p181_p0 }
   0x6   :  { %189 = shalt.err (!%p186_p2)
}
   0x7   :  { %s190_s21 = scalar_lea.vmem %s17_s13, 768  ;;  %p195_p4 = scmp.lt.s32.totalorder %s17_s13, %s17_s13 }
   0x8   :  { %p191_p3 = scmp.ne.s32.totalorder %s17_s13, %s190_s21  ;;  %p196_p5 = scmp.lt.s32.totalorder %s190_s21, %s190_s21 }
   0xa   :  { %p197_p6 = por %p196_p5, %p195_p4 }
   0xc   :  { %p198_p7 = pnand %p197_p6, %p191_p3 }
   0xe   :  { %201 = shalt.err (!%p198_p7)
}
   0xf   :  { %s205_s22 = smov 64   ;;  %s206_s23 = smov 4  }
  0x10   :  { %22 = dma.hbm_to_vmem [thread:$0]  %s252_s1, 768, %s17_s13, [#allocation3], %s205_s22, %s205_s22, %s206_s23  }
  0x11   :  { %202 = dma.done.wait [#allocation3], 768  }
  0x12   :  { %203 = vsyncadd [#allocation3], 4294966528  ;;  %v207_v0 = vmov 0.0   ;;  %vm208_vm0 = vmmov 0   ;;  %v209_v1 = vmov 0   ;;  %v174_v2 = vld [vmem:[#allocation2] sm:$0xff]  }
  0x13   :  { %151 = vmatprep.subr.bf16.mxu0 %v207_v0  ;;  %163 = vmatprep.mubr.msk.bf16.mxu0 %vm208_vm0, %v207_v0  ;;  %v175_v3 = vld [vmem:[#allocation2 + $0x8] sm:$0xff]   ;;  %v176_v4 = vld [vmem:[#allocation2 + $0x10] sm:$0xff]   ;;  %v42_v5 = vld [vmem:[%s253_s2] sm:$0x1f]  ;;  %vm84_vm1 = vcmask 785408  }
  0x14   :  { %173 = vset.pattern.permute.xlu0 %v209_v1  ;;  %152 = vmatpush3.bf16.msra.mxu0 %v174_v2  ;;  %v177_v6 = vld [vmem:[#allocation2 + $0x18] sm:$0xff]   ;;  %v178_v7 = vld [vmem:[#allocation2 + $0x20] sm:$0xff]   ;;  %v179_v8 = vld [vmem:[#allocation2 + $0x28] sm:$0xff]  }
  0x15   :  { %153 = vmatprep.subr.bf16.mxu0 %v207_v0  ;;  %45 = vperm.xlu0 %173, %v42_v5   ;;  %v29_v9 = vld [vmem:[%s251_s0] sm:$0x7] }
  0x18   :  { %154 = vmatpush3.bf16.msra.mxu0 %v175_v3 }
  0x19   :  { %155 = vmatprep.subr.bf16.mxu0 %v207_v0 }
  0x1c   :  { %156 = vmatpush3.bf16.msra.mxu0 %v176_v4 }
  0x1d   :  { %157 = vmatprep.subr.bf16.mxu0 %v207_v0 }
  0x20   :  { %158 = vmatpush3.bf16.msra.mxu0 %v177_v6 }
  0x21   :  { %159 = vmatprep.subr.bf16.mxu0 %v207_v0 }
  0x24   :  { %160 = vmatpush3.bf16.msra.mxu0 %v178_v7 }
  0x25   :  { %161 = vmatprep.subr.bf16.mxu0 %v207_v0 }
  0x28   :  { %162 = vmatpush3.bf16.msra.mxu0 %v179_v8 }
  0x2b   :  { %164 = vmatmul.mubr.msk.bf16.vlgmr.msra.gmra.mrb[0].mxu0 %vm84_vm1, %v29_v9 }
  0x94   :  { %v46_v10 = vpop.permute.xlu0 %45 }
  0xfe   :  { %v122_v11 = vpop.f32.mrb[0].mxu0 }
  0xff   :  { %v123_v12 = vadd.f32 %v122_v11, %v46_v10  ;;  %v165_v13 = vpop.f32.mrb[1].mxu0 }
 0x100   :  { %v125_v14 = vpop.f32.mrb[2].mxu0 }
 0x101   :  { %vm128_vm2 = vcmp.gt.f32.partialorder %v123_v12, 0.0  ;;  %v129_v15 = vmul.f32 0.2, %v123_v12  ;;  %v166_v16 = vpop.f32.mrb[3].mxu0 }
 0x103   :  { %v130_v17 = vsel %vm128_vm2, %v123_v12, %v129_v15 }
 0x104   :  { %131 = vst [vmem:[%s254_s3] sm:$0x1f] %v130_v17 }
 0x105   :  { %136 = vsyncpa [#allocation3], 1 }

</bundles_post_ra>
